<compile_context>
chip_gen: v5e
topology: v5e:2x2
jax: 0.10.0
libtpu: 0.0.40
codegen_flags: <defaults>
</compile_context>

<pallas_src>
import functools

import jax
import jax.numpy as jnp
from jax import lax
from jax.experimental import pallas as pl
from jax.experimental.pallas import tpu as pltpu


def _round_up(x, m):
    return (x + m - 1) // m * m


def _sepconv_kernel(x_ref, w_ref, o_ref, *, K, dilation, Wp, Lpad):
    """Fused separable conv: one im2col matmul per image.

    x_ref : (nb, Cin_p, Lin_pad)  padded images, spatial flattened on lanes
    w_ref : (Cout, K*K*Cin_p)     folded weights w[o, t*Cin_p + c] = pw[o,c]*dw[c,t]
    o_ref : (nb, Cout, Lpad)      dense (stride-1) output in padded-width coords

    out[o, p] = sum_{t=(i,j), c} w[o, t*Cin_p + c] * x[c, p + (i*Wp + j)*dilation]
    """
    nb = x_ref.shape[0]
    lin = x_ref.shape[2]
    w = w_ref[...]                                     # (Cout, K*K*Cin_p), 1-2 vregs

    for b in range(nb):                                # static, nb is tiny
        x_full = x_ref[b]                              # (Cin_p, Lin_pad): one aligned load
        pieces = []
        for i in range(K):
            for j in range(K):
                off = (i * Wp + j) * dilation          # static tap offset
                if off == 0:
                    shifted = x_full
                else:
                    # XLU lane rotation: shifted[:, p] == x_full[:, (p + off) % lin]
                    shifted = pltpu.roll(x_full, lin - off, axis=1)
                pieces.append(shifted[:, :Lpad])       # lane-aligned prefix slice
        patch = jnp.concatenate(pieces, axis=0)        # (K*K*Cin_p, Lpad), sublane-tiled
        o_ref[b] = jnp.dot(w, patch,
                           preferred_element_type=jnp.float32).astype(o_ref.dtype)


def _grid_steps(batch):
    """v5e/v6e (single TensorCore): one grid step for the whole batch.
    v7x (2 TCs/chip) and unknown parts: two 'parallel' steps when possible."""
    try:
        kind = jax.devices()[0].device_kind.lower()
    except Exception:
        kind = ""
    single_tc = any(s in kind for s in ("v5e", "v5 lite", "v6e", "v6 lite"))
    if single_tc or batch < 2:
        return 1
    return 2 if batch % 2 == 0 else 1


def separable_conv2d(x_nchw, dw_weight, pw_weight, *,
                     stride=1, padding=0, dilation=1):
    """x_nchw: (N, Cin, H, W); dw_weight: (Cin, 1, K, K) (torch depthwise,
    groups=Cin); pw_weight: (Cout, Cin, 1, 1). Returns NCHW output of
    pointwise_conv(depthwise_conv(x)), bias=False."""
    N, Cin, H, W = x_nchw.shape
    K = dw_weight.shape[-1]
    Cout = pw_weight.shape[0]

    Hp = H + 2 * padding
    Wp = W + 2 * padding
    span = dilation * (K - 1)                    # receptive-field span - 1
    H_out = (Hp - span - 1) // stride + 1
    W_out = (Wp - span - 1) // stride + 1
    H_full = Hp - span                           # dense (stride-1) row count
    L = H_full * Wp                              # dense output length (padded-width coords)
    Lpad = _round_up(L, 128)                     # lane-dense output (unmasked vst)
    Lin = Hp * Wp
    Lin_pad = _round_up(Lin, 128)                # lane-dense input (aligned vld)
    Cin_p = _round_up(Cin, 8)                    # whole sublane tiles per stacked tap

    # NCHW stays NCHW: pad channels + spatial, flatten spatial (free reshape),
    # then pad the flat length to a lane multiple.
    xp = jnp.pad(x_nchw, ((0, 0), (0, Cin_p - Cin),
                          (padding, padding), (padding, padding)))
    x_flat = xp.reshape(N, Cin_p, Lin)
    if Lin_pad > Lin:
        x_flat = jnp.pad(x_flat, ((0, 0), (0, 0), (0, Lin_pad - Lin)))

    # Fold depthwise taps into the pointwise contraction (tiny, done once):
    #   w_eff[o, t*Cin_p + c] = pw[o, c] * dw[c, t]   (zero for padded channels)
    dw_flat = dw_weight[:, 0, :, :].reshape(Cin, K * K).astype(jnp.float32)   # (Cin, KK)
    pw2 = pw_weight[:, :, 0, 0].astype(jnp.float32)                           # (Cout, Cin)
    w_eff = pw2[:, None, :] * jnp.transpose(dw_flat)[None, :, :]              # (Cout, KK, Cin)
    w_eff = jnp.pad(w_eff, ((0, 0), (0, 0), (0, Cin_p - Cin)))                # (Cout, KK, Cin_p)
    w_eff = w_eff.reshape(Cout, K * K * Cin_p).astype(x_nchw.dtype)
    # TODO(synk): at production sizes feed x / w_eff as bfloat16 (f32 accumulation
    # stays inside the dot) to halve HBM traffic; kept f32 here for the 1e-5 check.

    grid_n = _grid_steps(N)
    nb = N // grid_n

    kernel = functools.partial(_sepconv_kernel, K=K, dilation=dilation,
                               Wp=Wp, Lpad=Lpad)

    itemsize = jnp.dtype(x_nchw.dtype).itemsize
    flops = 2 * N * Cout * (K * K * Cin_p) * Lpad
    bytes_accessed = (N * Cin_p * Lin_pad * itemsize       # input
                      + N * Cout * Lpad * itemsize         # output
                      + Cout * K * K * Cin_p * itemsize)   # folded weights

    out_flat = pl.pallas_call(
        kernel,
        out_shape=jax.ShapeDtypeStruct((N, Cout, Lpad), x_nchw.dtype),
        grid_spec=pltpu.PrefetchScalarGridSpec(
            num_scalar_prefetch=0,
            grid=(grid_n,),
            in_specs=[
                pl.BlockSpec((nb, Cin_p, Lin_pad), lambda n: (n, 0, 0)),
                pl.BlockSpec((Cout, K * K * Cin_p), lambda n: (0, 0)),
            ],
            out_specs=pl.BlockSpec((nb, Cout, Lpad), lambda n: (n, 0, 0)),
        ),
        compiler_params=pltpu.CompilerParams(
            dimension_semantics=("parallel",),
            vmem_limit_bytes=32 * 1024 * 1024),
        cost_estimate=pl.CostEstimate(flops=flops, transcendentals=0,
                                      bytes_accessed=bytes_accessed),
    )(x_flat, w_eff)

    # Strip lane padding, reshape to (rows, padded width), strip the width
    # overhang and decimate for stride > 1.  Already NCHW channel order.
    y = out_flat[:, :, :L].reshape(N, Cout, H_full, Wp)
    y = y[:, :, ::stride, ::stride][:, :, :H_out, :W_out]
    return y


def _reference(x, dw_weight, pw_weight, *, stride, padding, dilation):
    """Pure-JAX reference matching torch F.conv2d semantics (NCHW)."""
    Cin = x.shape[1]
    y = lax.conv_general_dilated(
        x, dw_weight, window_strides=(stride, stride),
        padding=[(padding, padding), (padding, padding)],
        rhs_dilation=(dilation, dilation),
        dimension_numbers=("NCHW", "OIHW", "NCHW"),
        feature_group_count=Cin)
    y = lax.conv_general_dilated(
        y, pw_weight, window_strides=(1, 1), padding=[(0, 0), (0, 0)],
        dimension_numbers=("NCHW", "OIHW", "NCHW"))
    return y


def _check(x, dw_weight, pw_weight, *, stride, padding, dilation):
    out = separable_conv2d(x, dw_weight, pw_weight,
                           stride=stride, padding=padding, dilation=dilation)
    out = jax.block_until_ready(out)
    ref = _reference(x, dw_weight, pw_weight,
                     stride=stride, padding=padding, dilation=dilation)
    assert out.shape == ref.shape, (out.shape, ref.shape)
    assert jnp.allclose(out, ref, atol=1e-5, rtol=1e-5), (
        float(jnp.max(jnp.abs(out - ref))))
    return out


if __name__ == "__main__":
    # Module config: SeparableConv2d(in_channels=4, out_channels=8,
    #                                kernel_size=3, stride=1, padding=1,
    #                                dilation=1, bias=False)
    N, Cin, H, W = 2, 4, 16, 16
    Cout, K = 8, 3

    key = jax.random.PRNGKey(0)
    kx, kdw, kpw = jax.random.split(key, 3)
    x = jax.random.normal(kx, (N, Cin, H, W), dtype=jnp.float32)
    dw_weight = 0.1 * jax.random.normal(kdw, (Cin, 1, K, K), dtype=jnp.float32)
    pw_weight = 0.1 * jax.random.normal(kpw, (Cout, Cin, 1, 1), dtype=jnp.float32)

    # Primary config from the module spec.
    out = _check(x, dw_weight, pw_weight, stride=1, padding=1, dilation=1)
    assert out.shape == (N, Cout, H, W), out.shape

    # Extra coverage for stride / dilation paths (wrapper-side handling).
    _check(x, dw_weight, pw_weight, stride=2, padding=1, dilation=1)
    _check(x, dw_weight, pw_weight, stride=1, padding=2, dilation=2)

    print("KERNEL_OK")
</pallas_src>

<mosaic_0001>
module attributes {stable_mosaic.version = 11 : i64} {
  func.func @_sepconv_kernel(%arg0: i32, %arg1: memref<1x8x384xf32, #tpu.memory_space<vmem>>, %arg2: memref<8x72xf32, #tpu.memory_space<vmem>>, %arg3: memref<1x8x384xf32, #tpu.memory_space<vmem>>) attributes {dimension_semantics = [#tpu.dimension_semantics<parallel>], iteration_bounds = array<i64: 2>, scalar_prefetch = 0 : i64, scratch_operands = 0 : i64, tpu.core_type = #tpu.core_type<tc>, window_params = [{transform_indices = @transform_0, window_bounds = array<i64: 1, 8, 384>}, {pipeline_mode = #tpu.pipeline_mode<synchronous>, transform_indices = @transform_1, window_bounds = array<i64: 8, 72>}, {transform_indices = @transform_2, window_bounds = array<i64: 1, 8, 384>}]} {
    %c0 = arith.constant 0 : index
    %c0_0 = arith.constant 0 : index
    %0 = vector.load %arg2[%c0, %c0_0] : memref<8x72xf32, #tpu.memory_space<vmem>>, vector<8x72xf32>
    %c0_1 = arith.constant 0 : index
    %c0_2 = arith.constant 0 : index
    %c0_3 = arith.constant 0 : index
    %1 = vector.load %arg1[%c0_1, %c0_2, %c0_3] : memref<1x8x384xf32, #tpu.memory_space<vmem>>, vector<1x8x384xf32>
    %2 = vector.shape_cast %1 : vector<1x8x384xf32> to vector<8x384xf32>
    %c383_i32 = arith.constant 383 : i32
    %3 = tpu.dynamic_rotate %2 by %c383_i32 dim 1 : vector<8x384xf32>, i32 -> vector<8x384xf32>
    %c382_i32 = arith.constant 382 : i32
    %4 = tpu.dynamic_rotate %2 by %c382_i32 dim 1 : vector<8x384xf32>, i32 -> vector<8x384xf32>
    %c366_i32 = arith.constant 366 : i32
    %5 = tpu.dynamic_rotate %2 by %c366_i32 dim 1 : vector<8x384xf32>, i32 -> vector<8x384xf32>
    %c365_i32 = arith.constant 365 : i32
    %6 = tpu.dynamic_rotate %2 by %c365_i32 dim 1 : vector<8x384xf32>, i32 -> vector<8x384xf32>
    %c364_i32 = arith.constant 364 : i32
    %7 = tpu.dynamic_rotate %2 by %c364_i32 dim 1 : vector<8x384xf32>, i32 -> vector<8x384xf32>
    %c348_i32 = arith.constant 348 : i32
    %8 = tpu.dynamic_rotate %2 by %c348_i32 dim 1 : vector<8x384xf32>, i32 -> vector<8x384xf32>
    %c347_i32 = arith.constant 347 : i32
    %9 = tpu.dynamic_rotate %2 by %c347_i32 dim 1 : vector<8x384xf32>, i32 -> vector<8x384xf32>
    %c346_i32 = arith.constant 346 : i32
    %10 = tpu.dynamic_rotate %2 by %c346_i32 dim 1 : vector<8x384xf32>, i32 -> vector<8x384xf32>
    %11 = tpu.concatenate %2, %3, %4, %5, %6, %7, %8, %9, %10 in 0 : vector<8x384xf32>, vector<8x384xf32>, vector<8x384xf32>, vector<8x384xf32>, vector<8x384xf32>, vector<8x384xf32>, vector<8x384xf32>, vector<8x384xf32>, vector<8x384xf32> -> vector<72x384xf32>
    %cst = arith.constant dense<0.000000e+00> : vector<8x384xf32>
    %12 = tpu.matmul %0, %11, %cst {dimension_numbers = #tpu.dot_dimension_numbers<[1], [0], [0], [1], [0, 0, 1, 1], [], []>} : vector<8x72xf32>, vector<72x384xf32>, vector<8x384xf32> -> vector<8x384xf32>
    %c0_4 = arith.constant 0 : index
    %c0_5 = arith.constant 0 : index
    %c0_6 = arith.constant 0 : index
    %13 = vector.load %arg3[%c0_4, %c0_5, %c0_6] : memref<1x8x384xf32, #tpu.memory_space<vmem>>, vector<1x8x384xf32>
    %14 = vector.shape_cast %13 : vector<1x8x384xf32> to vector<8x384xf32>
    %15 = vector.shape_cast %12 : vector<8x384xf32> to vector<1x8x384xf32>
    tpu.vector_store %arg3[%c0_4, %c0_5, %c0_6], %15 {strides = array<i32>} : memref<1x8x384xf32, #tpu.memory_space<vmem>>, vector<1x8x384xf32>,
    return
  }
  func.func @transform_0(%arg0: i32) -> (i32, i32, i32) {
    %c0_i32 = arith.constant 0 : i32
    %c0_i32_0 = arith.constant 0 : i32
    %c0_i32_1 = arith.constant 0 : i32
    return %arg0, %c0_i32, %c0_i32_0 : i32, i32, i32
  }
  func.func @transform_1(%arg0: i32) -> (i32, i32) {
    %c0_i32 = arith.constant 0 : i32
    %c0_i32_0 = arith.constant 0 : i32
    %c0_i32_1 = arith.constant 0 : i32
    return %c0_i32, %c0_i32_0 : i32, i32
  }
  func.func @transform_2(%arg0: i32) -> (i32, i32, i32) {
    %c0_i32 = arith.constant 0 : i32
    %c0_i32_0 = arith.constant 0 : i32
    %c0_i32_1 = arith.constant 0 : i32
    return %arg0, %c0_i32, %c0_i32_0 : i32, i32, i32
  }
}

</mosaic_0001>

<bundles_post_ra>
// kernel: tpu_custom_call.1
= control target key start
LH: loop header
LB: loop body
LE: loop exit
PB: predicated region body
PF: predicated region fallthrough
CT: control target
= control target key end

     0   :  { %7 = vsyncpa [#allocation3], 0  ;;  %s925_s0 = inlined_call_operand.hbm [shape: f32[2,8,384], index: 0, kind: input, shape index: {}]   ;;  %s926_s1 = inlined_call_operand.hbm [shape: f32[8,72], index: 1, kind: input, shape index: {}]   ;;  %s927_s2 = inlined_call_operand.hbm [shape: f32[2,8,384], index: 2, kind: output, shape index: {}]  }
   0x1   :  { %9 = vsyncpa [#allocation3 + $0x1], 0 }
   0x2   :  { %10 = vsyncpa [#allocation6], 0 }
   0x3   :  { %11 = vsyncpa [#allocation4], 0 }
   0x4   :  { %13 = vsyncpa [#allocation4 + $0x1], 0  ;;  %s705_s9 = smov 0   ;;  %s707_s10 = smov 0  }
   0x5   :  { %s709_s11 = smov 0   ;;  %s711_s12 = smov 0  }
   0x6 LB: > { %s726_s13 = sadd.s32 4294967295, %s679_s12   ;;  %s427_s14 = sadd.s32 4294967294, %s679_s12   ;;  %s679_s12 = sphi %s711_s12, %s937_s12   ;;  %s675_s11 = sphi %s709_s11, %s936_s11   ;;  %s671_s10 = sphi %s707_s10, %s935_s10   ;;  %s667_s9 = sphi %s705_s9, %s934_s9  }
   0x7   : > { %p39_p0 = scmp.ne.s32.totalorder %s671_s10, %s667_s9  ;;  %p40_p1 = scmp.eq.s32.totalorder %s726_s13, 0 }
   0x8   : > { %p84_p2 = scmp.eq.s32.totalorder %s726_s13, 1  ;;  %p90_p3 = scmp.eq.s32.totalorder %s427_s14, 1 }
   0x9   : > { %p735_p4 = por %p40_p1, %p39_p0  ;;  %p428_p5 = scmp.ge.s32.totalorder %s679_s12, 1 }
   0xa   : > { %p740_p6 = por %p90_p3, %p39_p0  ;;  %p97_p7 = scmp.lt.s32.totalorder %s679_s12, 3 }
   0xb   : > { %s109_s19 = sshll.u32 %s926_s1, 4  ;;  %s681_s21 = smov [#allocation5]   ;;  %s110_s19 = int_to_ptr.hbm [resolvable:$true] %s109_s19 }
   0xc   : > { %p748_p8 = pnand %p428_p5, %p97_p7  ;;  %s111_s22 = sshll.u32 %s681_s21, 4  ;;  %s112_s22 = int_to_ptr.vmem [resolvable:$true] %s111_s22 }
   0xd   : > { %s758_s23 = sadd.s32 1, %s679_s12   ;;  %s26_s24 = sadd.s32 1, %s675_s11 }
   0xe   : > { %p452_p10 = pneg %p748_p8  ;;  %s23_s25 = ssub.s32 %s679_s12, %s758_s23 }
   0xf   : > { %p24_p12 = scmp.eq.s32.totalorder %s23_s25, 0  ;;  %p33_p13 = scmp.ne.s32.totalorder %s675_s11, %s671_s10 }
  0x10   : > { %p453_p11 = pnand %p452_p10, %p40_p1  ;;  %p34_p0 = scmp.eq.s32.totalorder %s679_s12, 0 }
  0x11   : > { %p465_p3 = scmp.lt.s32.totalorder %s679_s12, 2  ;;  %p772_p7 = por %p84_p2, %p33_p13 }
  0x12   : > { %455 = dma.hbm_to_vmem [thread:$0]  (!%p453_p11), %s110_s19, 128, %s112_s22, [#allocation6]  }
  0x13   : > { %s768_s26 = scalar_select %p24_p12, %s675_s11, %s26_s24  }
  0x14   : > { %p35_p5 = por %p34_p0, %p33_p13  ;;  %s122_s28 = sand.u32 1, %s675_s11  }
  0x15   : > { %s441_s29 = smul.u32 24, %s679_s12  ;;  %s123_s17 = scalar_lea.sflag [#allocation3], %s122_s28 }
  0x16   : > { %s440_s30 = smul.u32 24, %s122_s28  ;;  %p781_p10 = pnand %p465_p3, %p35_p5 }
  0x17   : > { %s131_s5 = scalar_lea.hbm %s925_s0, %s441_s29  ;;  %s586_s24 = scalar_lea.hbm %s925_s0, 48 }
  0x18   : > { %s133_s7 = sshll.u32 %s131_s5, 4  ;;  %s126_s8 = scalar_lea.vmem [#allocation2], %s440_s30  ;;  %s134_s7 = int_to_ptr.hbm [resolvable:$true] %s133_s7 }
  0x19   : > { %s135_s14 = sshll.u32 %s126_s8, 4  ;;  %s579_s18 = sshra.s32 %s134_s7, 4  ;;  %s136_s14 = int_to_ptr.vmem [resolvable:$true] %s135_s14  ;;  %s580_s18 = int_to_ptr.hbm [resolvable:$true] %s579_s18 }
  0x1a   : > { %s581_s19 = scalar_lea.hbm %s580_s18, 24  ;;  %p583_p11 = pneg %p781_p10 }
  0x1b   : > { %p582_p2 = scmp.ne.s32.totalorder %s580_s18, %s581_s19  ;;  %p587_p0 = scmp.lt.s32.totalorder %s580_s18, %s925_s0 }
  0x1c   : > { %p588_p3 = scmp.lt.s32.totalorder %s586_s24, %s581_s19 }
  0x1d   : > { %p584_p12 = pnand %p583_p11, %p582_p2 }
  0x1e   : > { %p589_p5 = por %p588_p3, %p587_p0 }
  0x1f   : > { %p585_p13 = pneg %p584_p12 }
  0x21   : > { %p590_p9 = pnand %p589_p5, %p585_p13 }
  0x23   : > { %593 = shalt.err (!%p590_p9)
}
  0x24   : > { %459 = dma.hbm_to_vmem [thread:$0]  (!%p781_p10), %s134_s7, 384, %s136_s14, %s123_s17  }
  0x25   : > { %144 = sbr.rel (%p748_p8) target bundleno = 337 (0x151), region = 28  ;;  %s798_s28 = sand.u32 (!%p748_p8), 1, %s671_s10  }
  0x26   : > { %s442_s30 = smul.u32 (!%p748_p8), 24, %s798_s28  ;;  %s147_s3 = scalar_lea.sflag (!%p748_p8), [#allocation3], %s798_s28 }
  0x28   : > { %s150_s4 = scalar_lea.vmem (!%p748_p8), [#allocation2], %s442_s30 }
  0x2a   : > { %654 = dma.done.wait (%p735_p4), %s147_s3, 384  }
  0x2b   : > { %656 = vsyncadd (%p735_p4), %s147_s3, 4294966912 }
  0x2c   : > { %658 = dma.done.wait (%p40_p1), [#allocation6], 128  }
  0x2d   : > { %660 = vsyncadd (%p40_p1), [#allocation6], 4294967168  ;;  %v812_v0 = vld [vmem:[%s150_s4] sm:$0xff]  ;;  %v814_v1 = vld [vmem:[%s150_s4 + $0x10] sm:$0xff]  ;;  %s682_s20 = smov 90   ;;  %s683_s15 = smov 92   ;;  %v187_v4 = vlaneseq }
  0x2e   : > { %v816_v2 = vld [vmem:[%s150_s4 + $0x8] sm:$0xff]  ;;  %v519_v3 = vpack.i.bf16 %v814_v1, %v812_v0  ;;  %s684_s5 = smov 109   ;;  %s685_s6 = smov 108   ;;  %v177_v50 = vld [vmem:[#allocation5] sm:$0xff]  ;;  %vm263_vm8 = vcmask 588800  }
  0x2f   : > { %255 = vrot.lane.b32.xlu2 %v816_v2, %s682_s20  ;;  %s686_s7 = smov 91   ;;  %s687_s8 = smov 110   ;;  %v828_v6 = vand.u32 127, %v187_v4 }
  0x30   : > { %520 = vrot.lane.b32.xlu1 %v519_v3, %s683_s15  ;;  %510 = vrot.lane.b32.xlu0 %v519_v3, %s682_s20  ;;  %s688_s14 = smov 127   ;;  %s689_s17 = smov 126  }
  0x31   : > { %vm259_vm0 = vcmp.lt.s32.totalorder %v828_v6, 90  ;;  %vm249_vm1 = vcmp.lt.s32.totalorder %v828_v6, 91  ;;  %vm239_vm2 = vcmp.lt.s32.totalorder %v828_v6, 92  ;;  %vm229_vm3 = vcmp.lt.s32.totalorder %v828_v6, 108  ;;  %s443_s18 = smul.u32 24, %s726_s13  ;;  %s176_s24 = scalar_lea.vmem [#allocation7], %s442_s30 }
  0x32   : > { %vm219_vm4 = vcmp.lt.s32.totalorder %v828_v6, 109  ;;  %vm209_vm5 = vcmp.lt.s32.totalorder %v828_v6, 110  ;;  %vm199_vm6 = vcmp.lt.s32.totalorder %v828_v6, 126  ;;  %vm189_vm7 = vcmp.lt.s32.totalorder %v828_v6, 127  ;;  %s344_s25 = sshll.u32 %s176_s24, 4  ;;  %s331_s3 = scalar_lea.sflag [#allocation4], %s798_s28  ;;  %s345_s25 = int_to_ptr.vmem [resolvable:$true] %s344_s25 }
  0x33   : > { %s342_s22 = scalar_lea.hbm %s927_s2, %s443_s18  ;;  %s629_s30 = scalar_lea.hbm %s927_s2, 48 }
  0x34   : > { %s346_s29 = sshll.u32 %s342_s22, 4  ;;  %s347_s29 = int_to_ptr.hbm [resolvable:$true] %s346_s29 }
  0x35   : > { %s623_s4 = sshra.s32 %s347_s29, 4  ;;  %s624_s4 = int_to_ptr.hbm [resolvable:$true] %s623_s4 }
  0x36   : > { %s625_s13 = scalar_lea.hbm %s624_s4, 24  ;;  %p630_p9 = scmp.lt.s32.totalorder %s624_s4, %s927_s2 }
  0x37   : > { %530 = vrot.lane.b32.xlu2 %v519_v3, %s684_s5  ;;  %p626_p1 = scmp.ne.s32.totalorder %s624_s4, %s625_s13  ;;  %p631_p10 = scmp.lt.s32.totalorder %s629_s30, %s625_s13 }
  0x38   : > { %525 = vrot.lane.b32.xlu1 %v519_v3, %s685_s6  ;;  %515 = vrot.lane.b32.xlu0 %v519_v3, %s686_s7 }
  0x39   : > { %p627_p4 = pnand %p626_p1, %p772_p7  ;;  %p632_p2 = por %p631_p10, %p630_p9 }
  0x3b   : > { %p628_p8 = pneg %p627_p4 }
  0x3d   : > { %p633_p11 = pnand %p632_p2, %p628_p8 }
  0x3f   : > { %235 = vrot.lane.b32.xlu2 %v816_v2, %s683_s15 }
  0x40   : > { %535 = vrot.lane.b32.xlu1 %v519_v3, %s687_s8  ;;  %245 = vrot.lane.b32.xlu0 %v816_v2, %s686_s7 }
  0x47   : > { %545 = vrot.lane.b32.xlu2 %v519_v3, %s688_s14 }
  0x48   : > { %225 = vrot.lane.b32.xlu1 %v816_v2, %s685_s6  ;;  %540 = vrot.lane.b32.xlu0 %v519_v3, %s689_s17 }
  0x4f   : > { %195 = vrot.lane.b32.xlu2 %v816_v2, %s689_s17 }
  0x50   : > { %205 = vrot.lane.b32.xlu1 %v816_v2, %s687_s8  ;;  %215 = vrot.lane.b32.xlu0 %v816_v2, %s684_s5 }
  0x58   : > { %183 = vrot.lane.b32.xlu0 %v816_v2, %s688_s14 }
  0x89   : > { %v256_v5 = vpop.permute.xlu2 %255 }
  0x91   : > { %v831_v14 = vpop.permute.xlu2 %530 }
  0x92   : > { %v533_v24 = vunpack.i.h.bf16 %v831_v14  ;;  %v532_v25 = vunpack.i.l.bf16 %v831_v14 }
  0x94   : > { %v222_v31 = vsel %vm219_vm4, %v533_v24, %v532_v25 }
  0x99   : > { %v236_v28 = vpop.permute.xlu2 %235 }
  0xa1   : > { %v546_v39 = vpop.permute.xlu2 %545 }
  0xa2   : > { %v521_v7 = vpop.permute.xlu1 %520  ;;  %v511_v8 = vpop.permute.xlu0 %510  ;;  %v548_v40 = vunpack.i.h.bf16 %v546_v39  ;;  %v547_v41 = vunpack.i.l.bf16 %v546_v39 }
  0xa3   : > { %v513_v9 = vunpack.i.h.bf16 %v511_v8  ;;  %v512_v10 = vunpack.i.l.bf16 %v511_v8  ;;  %v523_v15 = vunpack.i.h.bf16 %v521_v7  ;;  %v522_v16 = vunpack.i.l.bf16 %v521_v7 }
  0xa4   : > { %v192_v49 = vsel %vm189_vm7, %v548_v40, %v547_v41 }
  0xa5   : > { %v261_v11 = vsel %vm259_vm0, %v512_v10, %v256_v5  ;;  %v260_v12 = vsel %vm259_vm0, %v256_v5, %v513_v9  ;;  %v262_v13 = vsel %vm259_vm0, %v513_v9, %v512_v10  ;;  %v242_v26 = vsel %vm239_vm2, %v523_v15, %v522_v16 }
  0xa6   : > { %274 = vmatpush.msra.mxu0 %v261_v11  ;;  %294 = vmatpush.msra.mxu1 %v260_v12  ;;  %v241_v36 = vsel %vm239_vm2, %v522_v16, %v236_v28  ;;  %v240_v37 = vsel %vm239_vm2, %v236_v28, %v523_v15 }
  0xa7   : > { %314 = vmatpush.msra.mxu2 %v262_v13 }
  0xa9   : > { %v196_v55 = vpop.permute.xlu2 %195 }
  0xaa   : > { %v526_v17 = vpop.permute.xlu1 %525  ;;  %v516_v18 = vpop.permute.xlu0 %515 }
  0xab   : > { %v528_v19 = vunpack.i.h.bf16 %v526_v17  ;;  %v527_v20 = vunpack.i.l.bf16 %v526_v17  ;;  %v518_v21 = vunpack.i.h.bf16 %v516_v18  ;;  %v517_v22 = vunpack.i.l.bf16 %v516_v18 }
  0xad   : > { %v252_v23 = vsel %vm249_vm1, %v518_v21, %v517_v22  ;;  %v232_v27 = vsel %vm229_vm3, %v528_v19, %v527_v20 }
  0xae   : > { %315 = vmatpush.msra.mxu2 %v252_v23 }
  0xb0   : > { %316 = vmatpush.msra.mxu2 %v242_v26 }
  0xb2   : > { %v536_v29 = vpop.permute.xlu1 %535  ;;  %v246_v30 = vpop.permute.xlu0 %245  ;;  %317 = vmatpush.msra.mxu2 %v232_v27 }
  0xb3   : > { %v538_v32 = vunpack.i.h.bf16 %v536_v29  ;;  %v537_v33 = vunpack.i.l.bf16 %v536_v29  ;;  %v251_v34 = vsel %vm249_vm1, %v517_v22, %v246_v30  ;;  %v250_v35 = vsel %vm249_vm1, %v246_v30, %v518_v21 }
  0xb4   : > { %275 = vmatpush.msra.mxu0 %v251_v34  ;;  %295 = vmatpush.msra.mxu1 %v250_v35 }
  0xb5   : > { %318 = vmatpush.msra.mxu2 %v222_v31  ;;  %v212_v38 = vsel %vm209_vm5, %v538_v32, %v537_v33 }
  0xb6   : > { %276 = vmatpush.msra.mxu0 %v241_v36  ;;  %296 = vmatpush.msra.mxu1 %v240_v37 }
  0xb7   : > { %319 = vmatpush.msra.mxu2 %v212_v38 }
  0xba   : > { %v226_v42 = vpop.permute.xlu1 %225  ;;  %v541_v43 = vpop.permute.xlu0 %540 }
  0xbb   : > { %v543_v44 = vunpack.i.h.bf16 %v541_v43  ;;  %v542_v45 = vunpack.i.l.bf16 %v541_v43  ;;  %v231_v46 = vsel %vm229_vm3, %v527_v20, %v226_v42  ;;  %v230_v47 = vsel %vm229_vm3, %v226_v42, %v528_v19 }
  0xbc   : > { %277 = vmatpush.msra.mxu0 %v231_v46  ;;  %297 = vmatpush.msra.mxu1 %v230_v47 }
  0xbd   : > { %v202_v48 = vsel %vm199_vm6, %v543_v44, %v542_v45  ;;  %v201_v58 = vsel %vm199_vm6, %v542_v45, %v196_v55  ;;  %v200_v59 = vsel %vm199_vm6, %v196_v55, %v543_v44 }
  0xbe   : > { %320 = vmatpush.msra.mxu2 %v202_v48 }
  0xc0   : > { %321 = vmatpush.msra.mxu2 %v192_v49 }
  0xc2   : > { %v206_v51 = vpop.permute.xlu1 %205  ;;  %v216_v52 = vpop.permute.xlu0 %215  ;;  %322 = vmatpush.msra.mxu2 %v814_v1 }
  0xc3   : > { %v221_v53 = vsel %vm219_vm4, %v532_v25, %v216_v52  ;;  %v220_v54 = vsel %vm219_vm4, %v216_v52, %v533_v24  ;;  %436 = vmatmul.msk.f32.vlgmr.msra.gmra.mxu2 %vm263_vm8, %v177_v50  ;;  %v211_v56 = vsel %vm209_vm5, %v537_v33, %v206_v51  ;;  %v210_v57 = vsel %vm209_vm5, %v206_v51, %v538_v32 }
  0xc4   : > { %278 = vmatpush.msra.mxu0 %v221_v53  ;;  %298 = vmatpush.msra.mxu1 %v220_v54 }
  0xc6   : > { %279 = vmatpush.msra.mxu0 %v211_v56  ;;  %299 = vmatpush.msra.mxu1 %v210_v57 }
  0xc8   : > { %280 = vmatpush.msra.mxu0 %v201_v58  ;;  %300 = vmatpush.msra.mxu1 %v200_v59 }
  0xca   : > { %v184_v60 = vpop.permute.xlu0 %183 }
  0xcb   : > { %v191_v61 = vsel %vm189_vm7, %v547_v41, %v184_v60  ;;  %v190_v62 = vsel %vm189_vm7, %v184_v60, %v548_v40 }
  0xcc   : > { %281 = vmatpush.msra.mxu0 %v191_v61  ;;  %301 = vmatpush.msra.mxu1 %v190_v62 }
  0xce   : > { %282 = vmatpush.msra.mxu0 %v812_v0  ;;  %302 = vmatpush.msra.mxu1 %v816_v2 }
  0xcf   : > { %434 = vmatmul.msk.f32.vlgmr.msra.gmra.mxu0 %vm263_vm8, %v177_v50  ;;  %435 = vmatmul.msk.f32.vlgmr.msra.gmra.mxu1 %vm263_vm8, %v177_v50 }
 0x146   : > { %v324_v63 = vpop.f32.mrf.mxu2 }
 0x147   : > { %329 = vst [vmem:[%s176_s24 + $0x10] sm:$0xff] %v324_v63 }
 0x14c   : > { %v284_v0 = vpop.f32.mrf.mxu0  ;;  %v304_v1 = vpop.f32.mrf.mxu1 }
 0x14d   : > { %327 = vst [vmem:[%s176_s24] sm:$0xff] %v284_v0 }
 0x14e   : > { %328 = vst [vmem:[%s176_s24 + $0x8] sm:$0xff] %v304_v1 }
 0x14f   : > { %636 = shalt.err (!%p633_p11)
}
 0x150   : > { %450 = dma.vmem_to_hbm [thread:$0]  (%p772_p7), %s345_s25, 384, %s347_s29, %s331_s3  }
 0x151 PF: > { %s358_s28 = sand.u32 1, %s667_s9   ;;  %p933_p12 = scmp.ge.s32.totalorder %s679_s12, 2 }
 0x152   : > { %s359_s7 = scalar_lea.sflag [#allocation4], %s358_s28 }
 0x153   : > { %p461_p13 = pnand %p933_p12, %p740_p6 }
 0x155   : > { %p462_p0 = pneg %p461_p13 }
 0x157   : > { %662 = dma.done.wait (%p462_p0), %s359_s7, 384  }
 0x158   : > { %664 = vsyncadd (%p462_p0), %s359_s7, 4294966912  ;;  %p16_p3 = scmp.ge.s32.totalorder %s758_s23, 4   ;;  %s934_s9 = smov %s671_s10 }
 0x159   : > { %s935_s10 = smov %s675_s11  ;;  %s936_s11 = smov %s768_s26 }
 0x15a   : > { %s937_s12 = smov %s758_s23  ;;  %18 = sbr.rel (!%p16_p3) target bundleno = 6 (0x6), region = 77 }
 0x15f   :  { %365 = vsyncpa [#allocation3], 1 }
 0x160   :  { %367 = vsyncpa [#allocation3 + $0x1], 1 }
 0x161   :  { %368 = vsyncpa [#allocation6], 1 }
 0x162   :  { %369 = vsyncpa [#allocation4], 1 }
 0x163   :  { %371 = vsyncpa [#allocation4 + $0x1], 1 }

</bundles_post_ra>
